<compile_context>
chip_gen: v6e
topology: v6e:2x2x1
jax: 0.10.0
libtpu: 0.0.40
codegen_flags: <defaults>
</compile_context>

<pallas_src>
import jax
import jax.numpy as jnp
from jax.experimental import pallas as pl
from jax.experimental.pallas import tpu as pltpu

_LANES = 128


def _round_up(n, m):
    return ((n + m - 1) // m) * m


def mlp_kernel(x_ref, w1_ref, b1_ref, w2_ref, b2_ref, o_ref):
    # x_ref : (1, TB)   batch-on-lanes tile
    # w1_ref, b1_ref, w2_ref : (H, 128) pre-broadcast weights (resident in VMEM)
    # b2_ref: (1, 1)    scalar fc2 bias in SMEM
    # o_ref : (1, TB)   lane-dense output tile
    w1 = w1_ref[...]          # (H, 128), hoisted out of the chunk loop
    b1 = b1_ref[...]
    w2 = w2_ref[...]
    b2 = b2_ref[0, 0]

    n_chunks = o_ref.shape[1] // _LANES   # static: TB is a multiple of 128

    def body(c, carry):
        start = pl.multiple_of(c * _LANES, _LANES)
        x = x_ref[:, pl.ds(start, _LANES)]                    # (1, 128)
        # fc1 (K=1 matmul) as broadcast-mul + bias, then ReLU — all VPU.
        h = jnp.maximum(w1 * x + b1, 0.0)                     # (H, 128)
        # fc2 (N=1 matmul) as elementwise mul + sublane reduce.
        y = jnp.sum(h * w2, axis=0, keepdims=True)            # (1, 128)
        o_ref[:, pl.ds(start, _LANES)] = (y + b2).astype(o_ref.dtype)
        return carry

    jax.lax.fori_loop(0, n_chunks, body, 0)


def _choose_tile(B, tb_max):
    """Lane-dense tile (multiple of 128), capped at tb_max, >=2 grid steps when
    the batch is big enough that megacore sharding is worth it."""
    tile = min(tb_max, _round_up(B, _LANES))
    if pl.cdiv(B, tile) == 1 and tile > 1024:
        tile = _round_up(pl.cdiv(tile, 2), _LANES)
    return tile


def simple_nn_forward(x, w1, b1, w2, b2, *, tb=32768):
    """Forward pass of SimpleNN.

    x:  (B, 1)  float32   (PyTorch nn.Linear (N, features) convention)
    w1: (1, 64) float32   (in, out) layout
    b1: (1, 64) float32
    w2: (64, 1) float32   (in, out) layout
    b2: (1, 1)  float32
    returns (B, 1) float32
    """
    B = x.shape[0]
    H = w1.shape[1]

    tile = _choose_tile(B, tb)
    grid = (pl.cdiv(B, tile),)

    # Wrapper-side layout plumbing only: a free reshape and three tiny (H, 128)
    # pre-broadcast weight slabs.  No pads, no transposed HBM round trips.
    x_row = x.reshape(1, B)                           # (1, B), batch on lanes
    w1b = jnp.broadcast_to(w1.T, (H, _LANES))         # (H, 128)
    b1b = jnp.broadcast_to(b1.T, (H, _LANES))
    w2b = jnp.broadcast_to(w2, (H, _LANES))           # w2 already a column

    out = pl.pallas_call(
        mlp_kernel,
        out_shape=jax.ShapeDtypeStruct((1, B), jnp.float32),
        grid=grid,
        in_specs=[
            # Batch tile: new block per grid step; ragged last block is masked.
            pl.BlockSpec((1, tile), lambda i: (0, i)),
            # Weights: constant index_map -> DMA'd once, stay resident in VMEM.
            pl.BlockSpec((H, _LANES), lambda i: (0, 0)),
            pl.BlockSpec((H, _LANES), lambda i: (0, 0)),
            pl.BlockSpec((H, _LANES), lambda i: (0, 0)),
            # Scalar fc2 bias in SMEM.
            pl.BlockSpec(memory_space=pltpu.MemorySpace.SMEM),
        ],
        out_specs=pl.BlockSpec((1, tile), lambda i: (0, i)),
        compiler_params=pltpu.CompilerParams(
            dimension_semantics=("parallel",),
        ),
        cost_estimate=pl.CostEstimate(
            flops=5 * H * B,              # 2*H (fc1) + H (relu) + 2*H (fc2) per element
            transcendentals=0,
            bytes_accessed=8 * B + 3 * H * _LANES * 4 + 4,
        ),
    )(x_row, w1b, b1b, w2b, b2)

    return out.reshape(B, 1)


def init_params(key):
    """Deterministic init mimicking PyTorch Linear (uniform +/- 1/sqrt(fan_in))."""
    k1, k2, k3, k4 = jax.random.split(key, 4)
    # fc1: in=1, out=64
    bound1 = 1.0  # 1/sqrt(1)
    w1 = jax.random.uniform(k1, (1, 64), jnp.float32, -bound1, bound1)   # (in, out)
    b1 = jax.random.uniform(k2, (1, 64), jnp.float32, -bound1, bound1)
    # fc2: in=64, out=1
    bound2 = 1.0 / jnp.sqrt(64.0)
    w2 = jax.random.uniform(k3, (64, 1), jnp.float32, -bound2, bound2)   # (in, out)
    b2 = jax.random.uniform(k4, (1, 1), jnp.float32, -bound2, bound2)
    return w1, b1, w2, b2


if __name__ == "__main__":
    key = jax.random.PRNGKey(0)
    kx, kp = jax.random.split(key)

    w1, b1, w2, b2 = init_params(kp)

    def ref_forward(xin):
        # Same math as the PyTorch forward: fc2(relu(fc1(x))).
        return jnp.maximum(xin @ w1 + b1, 0.0) @ w2 + b2

    # Small batch (matches the original demo scale): single 128-lane block.
    B = 8
    x_small = jax.random.normal(kx, (B, 1), dtype=jnp.float32)
    out_small = simple_nn_forward(x_small, w1, b1, w2, b2)
    jax.block_until_ready(out_small)
    assert out_small.shape == (B, 1)
    assert jnp.allclose(out_small, ref_forward(x_small), atol=1e-5, rtol=1e-5)

    # Larger batch: multiple grid steps, in-kernel chunk loop, ragged last block.
    B2 = 2500
    x_big = jax.random.normal(kx, (B2, 1), dtype=jnp.float32)
    out_big = simple_nn_forward(x_big, w1, b1, w2, b2, tb=1024)
    jax.block_until_ready(out_big)
    assert out_big.shape == (B2, 1)
    assert jnp.allclose(out_big, ref_forward(x_big), atol=1e-5, rtol=1e-5)

    print("KERNEL_OK")
</pallas_src>

<mosaic_0001>
module attributes {stable_mosaic.version = 11 : i64} {
  func.func @mlp_kernel(%arg0: i32, %arg1: memref<1x128xf32, #tpu.memory_space<vmem>>, %arg2: memref<64x128xf32, #tpu.memory_space<vmem>>, %arg3: memref<64x128xf32, #tpu.memory_space<vmem>>, %arg4: memref<64x128xf32, #tpu.memory_space<vmem>>, %arg5: memref<1x1xf32, #tpu.memory_space<smem>>, %arg6: memref<1x128xf32, #tpu.memory_space<vmem>>) attributes {dimension_semantics = [#tpu.dimension_semantics<parallel>], iteration_bounds = array<i64: 1>, scalar_prefetch = 0 : i64, scratch_operands = 0 : i64, tpu.core_type = #tpu.core_type<tc>, window_params = [{transform_indices = @transform_0, window_bounds = array<i64: 1, 128>}, {pipeline_mode = #tpu.pipeline_mode<synchronous>, transform_indices = @transform_1, window_bounds = array<i64: 64, 128>}, {pipeline_mode = #tpu.pipeline_mode<synchronous>, transform_indices = @transform_2, window_bounds = array<i64: 64, 128>}, {pipeline_mode = #tpu.pipeline_mode<synchronous>, transform_indices = @transform_3, window_bounds = array<i64: 64, 128>}, {transform_indices = @transform_4, window_bounds = array<i64: 1, 1>}, {transform_indices = @transform_5, window_bounds = array<i64: 1, 128>}]} {
    %c0 = arith.constant 0 : index
    %c0_0 = arith.constant 0 : index
    %0 = vector.load %arg2[%c0, %c0_0] : memref<64x128xf32, #tpu.memory_space<vmem>>, vector<64x128xf32>
    %c0_1 = arith.constant 0 : index
    %c0_2 = arith.constant 0 : index
    %1 = vector.load %arg3[%c0_1, %c0_2] : memref<64x128xf32, #tpu.memory_space<vmem>>, vector<64x128xf32>
    %c0_3 = arith.constant 0 : index
    %c0_4 = arith.constant 0 : index
    %2 = vector.load %arg4[%c0_3, %c0_4] : memref<64x128xf32, #tpu.memory_space<vmem>>, vector<64x128xf32>
    %c0_5 = arith.constant 0 : index
    %c0_6 = arith.constant 0 : index
    %3 = memref.load %arg5[%c0_5, %c0_6] : memref<1x1xf32, #tpu.memory_space<smem>>
    %c0_i32 = arith.constant 0 : i32
    %c128_i32 = arith.constant 128 : i32
    %4 = arith.muli %c0_i32, %c128_i32 : i32
    %5 = tpu.assume_multiple %4, 128 : i32
    %c0_7 = arith.constant 0 : index
    %6 = arith.index_cast %5 : i32 to index
    %7 = vector.load %arg1[%c0_7, %6] : memref<1x128xf32, #tpu.memory_space<vmem>>, vector<1x128xf32>
    %8 = vector.broadcast %7 : vector<1x128xf32> to vector<64x128xf32>
    %9 = arith.mulf %0, %8 : vector<64x128xf32>
    %10 = arith.addf %9, %1 : vector<64x128xf32>
    %cst = arith.constant 0.000000e+00 : f32
    %11 = vector.broadcast %cst : f32 to vector<64x128xf32>
    %12 = arith.maximumf %10, %11 : vector<64x128xf32>
    %13 = arith.mulf %12, %2 : vector<64x128xf32>
    %cst_8 = arith.constant dense<0.000000e+00> : vector<128xf32>
    %14 = vector.multi_reduction <add>, %13, %cst_8 [0] : vector<64x128xf32> to vector<128xf32>
    %15 = vector.shape_cast %14 : vector<128xf32> to vector<1x128xf32>
    %16 = vector.broadcast %3 : f32 to vector<1x128xf32>
    %17 = arith.addf %15, %16 : vector<1x128xf32>
    %c0_9 = arith.constant 0 : index
    %18 = arith.index_cast %5 : i32 to index
    %19 = vector.load %arg6[%c0_9, %18] : memref<1x128xf32, #tpu.memory_space<vmem>>, vector<1x128xf32>
    tpu.vector_store %arg6[%c0_9, %18], %17 {strides = array<i32>} : memref<1x128xf32, #tpu.memory_space<vmem>>, vector<1x128xf32>,
    %c1_i32 = arith.constant 1 : i32
    return
  }
  func.func @transform_0(%arg0: i32) -> (i32, i32) {
    %c0_i32 = arith.constant 0 : i32
    %c0_i32_0 = arith.constant 0 : i32
    return %c0_i32, %arg0 : i32, i32
  }
  func.func @transform_1(%arg0: i32) -> (i32, i32) {
    %c0_i32 = arith.constant 0 : i32
    %c0_i32_0 = arith.constant 0 : i32
    %c0_i32_1 = arith.constant 0 : i32
    return %c0_i32, %c0_i32_0 : i32, i32
  }
  func.func @transform_2(%arg0: i32) -> (i32, i32) {
    %c0_i32 = arith.constant 0 : i32
    %c0_i32_0 = arith.constant 0 : i32
    %c0_i32_1 = arith.constant 0 : i32
    return %c0_i32, %c0_i32_0 : i32, i32
  }
  func.func @transform_3(%arg0: i32) -> (i32, i32) {
    %c0_i32 = arith.constant 0 : i32
    %c0_i32_0 = arith.constant 0 : i32
    %c0_i32_1 = arith.constant 0 : i32
    return %c0_i32, %c0_i32_0 : i32, i32
  }
  func.func @transform_4(%arg0: i32) -> (i32, i32) {
    %c0_i32 = arith.constant 0 : i32
    %c0_i32_0 = arith.constant 0 : i32
    %c0_i32_1 = arith.constant 0 : i32
    return %c0_i32, %c0_i32_0 : i32, i32
  }
  func.func @transform_5(%arg0: i32) -> (i32, i32) {
    %c0_i32 = arith.constant 0 : i32
    %c0_i32_0 = arith.constant 0 : i32
    return %c0_i32, %arg0 : i32, i32
  }
}

</mosaic_0001>

<bundles_post_ra>
// kernel: tpu_custom_call.1
= control target key start
LH: loop header
LB: loop body
LE: loop exit
PB: predicated region body
PF: predicated region fallthrough
CT: control target
= control target key end

     0   :  { %11 = vsyncpa [#allocation4], 0  ;;  %s306_s0 = inlined_call_operand.vmem [shape: f32[1,8], index: 0, kind: input, shape index: {}]   ;;  %s307_s1 = inlined_call_operand.hbm [shape: f32[64,128], index: 1, kind: input, shape index: {}]   ;;  %s308_s2 = inlined_call_operand.hbm [shape: f32[64,128], index: 2, kind: input, shape index: {}]   ;;  %s309_s3 = inlined_call_operand.hbm [shape: f32[64,128], index: 3, kind: input, shape index: {}]   ;;  %s310_s4 = inlined_call_operand.<no memory space> [shape: f32[1,1], index: 4, kind: input, shape index: {}]   ;;  %s311_s5 = inlined_call_operand.hbm [shape: f32[1,8], index: 5, kind: output, shape index: {}]  }
   0x1   :  { %12 = vsyncpa [#allocation7], 0 }
   0x2   :  { %13 = vsyncpa [#allocation5], 0  ;;  %s252_s18 = smov [#allocation6]   ;;  %s253_s20 = smov [#allocation3]  }
   0x3   :  { %s33_s19 = sshll.u32 %s252_s18, 4  ;;  %s21_s21 = sshll.u32 %s253_s20, 4  ;;  %s34_s19 = int_to_ptr.vmem [resolvable:$true] %s33_s19  ;;  %s22_s21 = int_to_ptr.vmem [resolvable:$true] %s21_s21 }
   0x4   :  { %s174_s22 = scalar_lea.vmem %s34_s19, 1024  ;;  %p179_p1 = scmp.lt.s32.totalorder %s34_s19, %s34_s19 }
   0x5   :  { %p175_p0 = scmp.ne.s32.totalorder %s34_s19, %s174_s22  ;;  %p180_p2 = scmp.lt.s32.totalorder %s174_s22, %s174_s22 }
   0x7   :  { %p181_p3 = por %p180_p2, %p179_p1 }
   0x9   :  { %p182_p4 = pnand %p181_p3, %p175_p0 }
   0xb   :  { %185 = shalt.err (!%p182_p4)
}
   0xc   :  { %s254_s23 = smov 128   ;;  %s255_s24 = smov 8  }
   0xd   :  { %39 = dma.hbm_to_vmem [thread:$0]  %s308_s2, 1024, %s34_s19, [#allocation7], %s254_s23, %s254_s23, %s255_s24  }
   0xe   :  { %s194_s27 = scalar_lea.vmem %s22_s21, 1024  ;;  %p199_p6 = scmp.lt.s32.totalorder %s22_s21, %s22_s21 }
   0xf   :  { %p195_p5 = scmp.ne.s32.totalorder %s22_s21, %s194_s27  ;;  %p200_p7 = scmp.lt.s32.totalorder %s194_s27, %s194_s27 }
  0x11   :  { %p201_p8 = por %p200_p7, %p199_p6 }
  0x13   :  { %p202_p9 = pnand %p201_p8, %p195_p5 }
  0x15   :  { %205 = shalt.err (!%p202_p9)
}
  0x16   :  { %27 = dma.hbm_to_vmem [thread:$0]  %s307_s1, 1024, %s22_s21, [#allocation4], %s254_s23, %s254_s23, %s255_s24  }
  0x17   :  { %s256_s30 = smov [#allocation8]  }
  0x18   :  { %s45_s6 = sshll.u32 %s256_s30, 4  ;;  %s46_s6 = int_to_ptr.vmem [resolvable:$true] %s45_s6 }
  0x19   :  { %s214_s7 = scalar_lea.vmem %s46_s6, 1024  ;;  %p219_p11 = scmp.lt.s32.totalorder %s46_s6, %s46_s6 }
  0x1a   :  { %p215_p10 = scmp.ne.s32.totalorder %s46_s6, %s214_s7  ;;  %p220_p12 = scmp.lt.s32.totalorder %s214_s7, %s214_s7 }
  0x1c   :  { %p221_p13 = por %p220_p12, %p219_p11 }
  0x1e   :  { %p222_p0 = pnand %p221_p13, %p215_p10 }
  0x20   :  { %225 = shalt.err (!%p222_p0)
}
  0x21   :  { %51 = dma.hbm_to_vmem [thread:$0]  %s309_s3, 1024, %s46_s6, [#allocation7], %s254_s23, %s254_s23, %s255_s24  }
  0x22   :  { %246 = dma.done.wait [#allocation4], 1024  }
  0x23   :  { %247 = vsyncadd [#allocation4], 4294966272 }
  0x24   :  { %248 = dma.done.wait [#allocation7], 2048  }
  0x25   :  { %249 = vsyncadd [#allocation7], 4294965248  ;;  %v63_v0 = vld [vmem:[#allocation3] sm:$0xff]  ;;  %v64_v1 = vld [vmem:[#allocation3 + $0x8] sm:$0xff]  ;;  %s257_s10 = smov [#allocation9]  }
  0x26   :  { %v65_v2 = vld [vmem:[#allocation3 + $0x10] sm:$0xff]  ;;  %v66_v3 = vld [vmem:[#allocation3 + $0x18] sm:$0xff]  ;;  %v67_v4 = vld [vmem:[#allocation3 + $0x20] sm:$0xff]  ;;  %s149_s11 = sshll.u32 %s257_s10, 4  ;;  %s150_s11 = int_to_ptr.vmem [resolvable:$true] %s149_s11 }
  0x27   :  { %v68_v5 = vld [vmem:[#allocation3 + $0x28] sm:$0xff]  ;;  %v69_v6 = vld [vmem:[#allocation3 + $0x30] sm:$0xff]  ;;  %v71_v7 = vld [vmem:[#allocation6] sm:$0xff]  ;;  %s226_s12 = scalar_lea.vmem %s150_s11, 16  ;;  %s230_s13 = scalar_lea.vmem %s150_s11, 32 }
  0x28   :  { %v72_v8 = vld [vmem:[#allocation6 + $0x8] sm:$0xff]  ;;  %v73_v9 = vld [vmem:[#allocation6 + $0x10] sm:$0xff]  ;;  %v74_v10 = vld [vmem:[#allocation6 + $0x18] sm:$0xff]  ;;  %p227_p1 = scmp.ne.s32.totalorder %s150_s11, %s226_s12  ;;  %p231_p2 = scmp.lt.s32.totalorder %s150_s11, %s150_s11 }
  0x29   :  { %v159_v11 = vld [vmem:[%s306_s0] ss:$0 sm:$0xff]  ;;  %v70_v12 = vld [vmem:[#allocation3 + $0x38] sm:$0xff]  ;;  %v76_v14 = vld [vmem:[#allocation6 + $0x28] sm:$0xff]  ;;  %p232_p3 = scmp.lt.s32.totalorder %s230_s13, %s226_s12 }
  0x2a   :  { %v75_v13 = vld [vmem:[#allocation6 + $0x20] sm:$0xff]  ;;  %v95_v15 = vmul.f32 %v159_v11, %v63_v0  ;;  %v96_v16 = vmul.f32 %v159_v11, %v64_v1  ;;  %v97_v17 = vmul.f32 %v159_v11, %v65_v2  ;;  %v98_v18 = vmul.f32 %v159_v11, %v66_v3  ;;  %v77_v22 = vld [vmem:[#allocation6 + $0x30] sm:$0xff]  ;;  %v80_v28 = vld [vmem:[#allocation8 + $0x8] sm:$0xff] }
  0x2b   :  { %v99_v19 = vmul.f32 %v159_v11, %v67_v4  ;;  %v100_v20 = vmul.f32 %v159_v11, %v68_v5  ;;  %v101_v21 = vmul.f32 %v159_v11, %v69_v6  ;;  %v79_v27 = vld [vmem:[#allocation8] sm:$0xff]  ;;  %v81_v29 = vld [vmem:[#allocation8 + $0x10] sm:$0xff]  ;;  %v102_v30 = vmul.f32 %v159_v11, %v70_v12  ;;  %v78_v37 = vld [vmem:[#allocation6 + $0x38] sm:$0xff]  ;;  %p233_p4 = por %p232_p3, %p231_p2 }
  0x2c   :  { %v103_v23 = vadd.f32 %v95_v15, %v71_v7  ;;  %v104_v24 = vadd.f32 %v96_v16, %v72_v8  ;;  %v105_v25 = vadd.f32 %v97_v17, %v73_v9  ;;  %v106_v26 = vadd.f32 %v98_v18, %v74_v10  ;;  %v82_v38 = vld [vmem:[#allocation8 + $0x18] sm:$0xff]  ;;  %v83_v44 = vld [vmem:[#allocation8 + $0x20] sm:$0xff]  ;;  %v84_v49 = vld [vmem:[#allocation8 + $0x28] sm:$0xff] }
  0x2d   :  { %v107_v31 = vadd.f32 %v99_v19, %v75_v13  ;;  %v108_v32 = vadd.f32 %v100_v20, %v76_v14  ;;  %v109_v39 = vadd.f32 %v101_v21, %v77_v22  ;;  %v110_v45 = vadd.f32 %v102_v30, %v78_v37  ;;  %v85_v53 = vld [vmem:[#allocation8 + $0x30] sm:$0xff]  ;;  %v86_v57 = vld [vmem:[#allocation8 + $0x38] sm:$0xff]  ;;  %p234_p5 = pnand %p233_p4, %p227_p1 }
  0x2e   :  { %v111_v33 = vmax.f32 %v103_v23, 0.0  ;;  %v112_v34 = vmax.f32 %v104_v24, 0.0  ;;  %v113_v35 = vmax.f32 %v105_v25, 0.0  ;;  %v114_v36 = vmax.f32 %v106_v26, 0.0 }
  0x2f   :  { %v115_v40 = vmax.f32 %v107_v31, 0.0  ;;  %v116_v46 = vmax.f32 %v108_v32, 0.0  ;;  %v117_v50 = vmax.f32 %v109_v39, 0.0  ;;  %v118_v54 = vmax.f32 %v110_v45, 0.0 }
  0x30   :  { %v119_v41 = vmul.f32 %v111_v33, %v79_v27  ;;  %v120_v42 = vmul.f32 %v112_v34, %v80_v28  ;;  %v121_v43 = vmul.f32 %v113_v35, %v81_v29  ;;  %v122_v47 = vmul.f32 %v114_v36, %v82_v38 }
  0x31   :  { %v123_v51 = vmul.f32 %v115_v40, %v83_v44  ;;  %v124_v55 = vmul.f32 %v116_v46, %v84_v49  ;;  %v125_v58 = vmul.f32 %v117_v50, %v85_v53  ;;  %v126_v60 = vmul.f32 %v118_v54, %v86_v57 }
  0x32   :  { %v127_v48 = vadd.f32 %v120_v42, %v119_v41  ;;  %v140_v5 = vstv %s310_s4 }
  0x34   :  { %v128_v52 = vadd.f32 %v127_v48, %v121_v43 }
  0x36   :  { %v129_v56 = vadd.f32 %v128_v52, %v122_v47 }
  0x38   :  { %v130_v59 = vadd.f32 %v129_v56, %v123_v51 }
  0x3a   :  { %v131_v61 = vadd.f32 %v130_v59, %v124_v55 }
  0x3c   :  { %v132_v62 = vadd.f32 %v131_v61, %v125_v58 }
  0x3e   :  { %v133_v63 = vadd.f32 %v132_v62, %v126_v60 }
  0x40   :  { %v134_v0 = vrot.slane %v133_v63, 4 }
  0x42   :  { %v135_v1 = vadd.f32 %v134_v0, %v133_v63 }
  0x44   :  { %v136_v2 = vrot.slane %v135_v1, 2 }
  0x46   :  { %v137_v3 = vadd.f32 %v136_v2, %v135_v1 }
  0x48   :  { %v138_v4 = vrot.slane %v137_v3, 1 }
  0x4a   :  { %v139_v6 = vadd.f32 %v138_v4, %v137_v3 }
  0x4c   :  { %v141_v7 = vadd.f32 %v140_v5, %v139_v6 }
  0x4e   :  { %142 = vst [vmem:[#allocation9] sm:$0x1] %v141_v7 }
  0x4f   :  { %237 = shalt.err (!%p234_p5)
}
  0x50   :  { %152 = dma.vmem_to_hbm [thread:$0]  %s150_s11, 16, %s311_s5, [#allocation5]  }
  0x51   :  { %250 = dma.done.wait [#allocation5], 16  }
  0x52   :  { %251 = vsyncadd [#allocation5], 4294967280 }
  0x53   :  { %156 = vsyncpa [#allocation4], 1 }
  0x54   :  { %157 = vsyncpa [#allocation7], 1 }
  0x55   :  { %158 = vsyncpa [#allocation5], 1 }

</bundles_post_ra>
